<compile_context>
chip_gen: v5e
topology: v5e:2x2
jax: 0.10.0
libtpu: 0.0.40
codegen_flags: <defaults>
</compile_context>

<pallas_src>
import functools

import jax
import jax.numpy as jnp
from jax.experimental import pallas as pl
from jax.experimental.pallas import tpu as pltpu


def _round_up(v, m):
    return ((v + m - 1) // m) * m


def _vmem_physical_bytes():
    """Per-core physical VMEM; conservative 64 MiB fallback (v7x) if the query fails."""
    try:
        return int(pltpu.get_tpu_info().vmem_capacity_bytes)
    except Exception:  # pragma: no cover - query unavailable at trace time
        return 64 << 20


def _mlp3_kernel(x_ref, w1_ref, b1_ref, w2_ref, b2_ref, w3_ref, b3_ref, o_ref):
    """Fused 3-layer MLP: linear -> relu -> linear -> relu -> linear -> sigmoid.

    Matmul operands are bf16 (MXU peak on v5e/v6e/v7x) with f32 accumulation;
    bias add / ReLU / sigmoid are kept in f32 (VPU/EUP friendly on all generations).
    """
    x = x_ref[...].astype(jnp.bfloat16)

    h = jnp.dot(x, w1_ref[...], preferred_element_type=jnp.float32) + b1_ref[...]
    h = jnp.maximum(h, 0.0)

    h = jnp.dot(h.astype(jnp.bfloat16), w2_ref[...],
                preferred_element_type=jnp.float32) + b2_ref[...]
    h = jnp.maximum(h, 0.0)

    h = jnp.dot(h.astype(jnp.bfloat16), w3_ref[...],
                preferred_element_type=jnp.float32) + b3_ref[...]

    o_ref[...] = jax.nn.sigmoid(h).astype(o_ref.dtype)


def prepare_params(params):
    """One-time prep: torch-style (out, in) weights -> (in, out) bf16, padded to 128 lanes.

    * Transpose to (in, out) so the kernel does plain x @ W.
    * Zero-pad the feature dim to a multiple of 128 (lane-dense blocks). Zero padding is
      exact: padded input columns are zero and padded weight rows/cols are zero, so valid
      output columns are unaffected; padded output columns are sliced off in the wrapper.
    * Cast weights to bf16 (MXU operands); biases stay f32 and become (1, Dp) rows.
    Do this once at init / load time so the per-call forward emits no transposes/casts
    of the weights.
    """
    w1, b1, w2, b2, w3, b3 = params
    D = w1.shape[0]
    Dp = _round_up(D, 128)
    pad = Dp - D

    def prep_w(w):
        wt = jnp.asarray(w, jnp.float32).T  # (in, out)
        if pad:
            wt = jnp.pad(wt, ((0, pad), (0, pad)))
        return wt.astype(jnp.bfloat16)

    def prep_b(b):
        b = jnp.asarray(b, jnp.float32)
        if pad:
            b = jnp.pad(b, (0, pad))
        return b.reshape(1, Dp)

    return (prep_w(w1), prep_b(b1), prep_w(w2), prep_b(b2), prep_w(w3), prep_b(b3))


@functools.partial(jax.jit, static_argnames=("block_b",))
def simple_fft_forward(x, prepped_params, block_b=None):
    """x: (B, samples, channels) float32.  prepped_params from prepare_params().

    Returns (None, y) with y the same shape as x (matches the torch module).
    """
    B, S, C = x.shape
    D = S * C
    w1t, b1r, w2t, b2r, w3t, b3r = prepped_params
    Dp = w1t.shape[0]

    x_flat = x.reshape(B, D).astype(jnp.float32)
    if Dp != D:
        x_flat = jnp.pad(x_flat, ((0, 0), (0, Dp - D)))

    # ---- VMEM budgeting (generation aware: 64 MiB/TC v7x, 128 MiB v5e/v6e) -----------
    phys = _vmem_physical_bytes()
    budget = int(phys * 0.8)
    headroom = 4 << 20
    weight_bytes = 3 * Dp * Dp * 2 + 3 * Dp * 4          # bf16 weights + f32 biases, resident
    io_per_row = 2 * 2 * Dp * 4                           # x + out tiles, double-buffered f32
    act_per_row = 4 * Dp * 4 + 2 * Dp * 2                 # f32 activation temps + bf16 casts
    per_row = io_per_row + act_per_row

    # ---- Batch tile selection ----------------------------------------------------------
    avail_row_bytes = max(budget - weight_bytes - headroom, 1 << 20)
    bm_vmem = max(8, (avail_row_bytes // per_row) // 8 * 8)
    cap = 1024 if Dp <= 256 else (512 if Dp <= 1024 else 256)  # fatter tiles when D small
    if block_b is not None:
        cap = min(cap, max(8, _round_up(block_b, 8)))
    bm = min(cap, bm_vmem, _round_up(B, 8))
    if B > 8:
        # >=2 grid steps so megacore sharding keeps both v7x TensorCores busy.
        bm = min(bm, _round_up(pl.cdiv(B, 2), 8))
    bm = max(bm, 8)

    # Pad batch so bm divides it: last tile never touches uninitialized VMEM rows.
    B_pad = _round_up(B, bm)
    if B_pad != B:
        x_flat = jnp.pad(x_flat, ((0, B_pad - B), (0, 0)))
    grid = (B_pad // bm,)

    vmem_bytes = min(weight_bytes + bm * per_row + headroom, budget)

    # Constant block index across the grid -> single-buffer to halve VMEM use.
    weight_spec = pl.BlockSpec((Dp, Dp), lambda i: (0, 0), pipeline_mode=pl.Buffered(1))
    bias_spec = pl.BlockSpec((1, Dp), lambda i: (0, 0), pipeline_mode=pl.Buffered(1))

    cost = pl.CostEstimate(
        flops=3 * 2 * B_pad * Dp * Dp + 5 * B_pad * Dp,
        transcendentals=B_pad * Dp,
        bytes_accessed=2 * B_pad * Dp * 4 + 3 * Dp * Dp * 2 + 3 * Dp * 4,
    )

    y_flat = pl.pallas_call(
        _mlp3_kernel,
        out_shape=jax.ShapeDtypeStruct((B_pad, Dp), x.dtype),
        grid_spec=pltpu.PrefetchScalarGridSpec(
            num_scalar_prefetch=0,
            grid=grid,
            in_specs=[
                pl.BlockSpec((bm, Dp), lambda i: (i, 0)),  # x tile
                weight_spec, bias_spec,                    # layer 1
                weight_spec, bias_spec,                    # layer 2
                weight_spec, bias_spec,                    # layer 3
            ],
            out_specs=pl.BlockSpec((bm, Dp), lambda i: (i, 0)),
        ),
        compiler_params=pltpu.CompilerParams(
            dimension_semantics=("parallel",),
            vmem_limit_bytes=int(vmem_bytes),
        ),
        cost_estimate=cost,
    )(x_flat, w1t, b1r, w2t, b2r, w3t, b3r)

    # TODO(synk): when 3*Dp*Dp*2 (bf16 weights) no longer fits the per-core VMEM budget
    # (Dp ~> 3K on v7x), stream per-layer weight K/N-tiles from HBM with
    # pltpu.emit_pipeline (or hold one layer's weight + double-buffer the next layer's
    # DMA) instead of keeping all three (Dp, Dp) blocks resident.
    return None, y_flat[:B, :D].reshape(B, S, C)


def init_params(key, chunk_size, channels):
    """Deterministic synthetic parameters, torch nn.Linear shapes: W (out, in), b (out,)."""
    D = chunk_size * channels
    keys = jax.random.split(key, 6)
    scale = 1.0 / jnp.sqrt(D)
    w1 = jax.random.uniform(keys[0], (D, D), jnp.float32, -scale, scale)
    b1 = jax.random.uniform(keys[1], (D,), jnp.float32, -scale, scale)
    w2 = jax.random.uniform(keys[2], (D, D), jnp.float32, -scale, scale)
    b2 = jax.random.uniform(keys[3], (D,), jnp.float32, -scale, scale)
    w3 = jax.random.uniform(keys[4], (D, D), jnp.float32, -scale, scale)
    b3 = jax.random.uniform(keys[5], (D,), jnp.float32, -scale, scale)
    return (w1, b1, w2, b2, w3, b3)


def _reference_forward(x, params):
    """Pure-JAX f32 reference mirroring the PyTorch module."""
    B, S, C = x.shape
    w1, b1, w2, b2, w3, b3 = params
    h = x.reshape(B, -1)
    h = jnp.maximum(h @ w1.T + b1, 0.0)
    h = jnp.maximum(h @ w2.T + b2, 0.0)
    h = h @ w3.T + b3
    return jax.nn.sigmoid(h).reshape(B, S, C)


if __name__ == "__main__":
    # Small shapes consistent with the module: samples == chunk_size so the
    # flattened dim matches the Linear layers' in/out features.
    batch = 8
    samples = chunk_size = 32
    channels = 4

    key = jax.random.PRNGKey(0)
    k_x, k_state, k_p = jax.random.split(key, 3)

    x = jax.random.normal(k_x, (batch, samples, channels), jnp.float32)
    state = jax.random.normal(k_state, (batch, 16, channels), jnp.float32)  # unused, like the module
    params = init_params(k_p, chunk_size, channels)

    # One-time parameter prep (transpose / pad / bf16 cast hoisted out of the per-call path).
    prepped = prepare_params(params)

    new_state, y = simple_fft_forward(x, prepped)
    y = jax.block_until_ready(y)

    assert new_state is None
    assert y.shape == x.shape, (y.shape, x.shape)

    # bf16 matmul operands (f32 accumulation) -> loosened tolerance vs the f32 reference.
    y_ref = _reference_forward(x, params)
    max_err = float(jnp.max(jnp.abs(y - y_ref)))
    assert jnp.allclose(y, y_ref, atol=2e-2, rtol=2e-2), max_err

    print("KERNEL_OK")
</pallas_src>

<mosaic_0001>
module attributes {stable_mosaic.version = 11 : i64} {
  func.func @_mlp3_kernel(%arg0: i32, %arg1: memref<8x128xf32, #tpu.memory_space<vmem>>, %arg2: memref<128x128xbf16, #tpu.memory_space<vmem>>, %arg3: memref<1x128xf32, #tpu.memory_space<vmem>>, %arg4: memref<128x128xbf16, #tpu.memory_space<vmem>>, %arg5: memref<1x128xf32, #tpu.memory_space<vmem>>, %arg6: memref<128x128xbf16, #tpu.memory_space<vmem>>, %arg7: memref<1x128xf32, #tpu.memory_space<vmem>>, %arg8: memref<8x128xf32, #tpu.memory_space<vmem>>) attributes {dimension_semantics = [#tpu.dimension_semantics<parallel>], iteration_bounds = array<i64: 1>, scalar_prefetch = 0 : i64, scratch_operands = 0 : i64, tpu.core_type = #tpu.core_type<tc>, window_params = [{transform_indices = @transform_0, window_bounds = array<i64: 8, 128>}, {pipeline_mode = #tpu.pipeline_mode<synchronous>, transform_indices = @transform_1, window_bounds = array<i64: 128, 128>}, {pipeline_mode = #tpu.pipeline_mode<synchronous>, transform_indices = @transform_2, window_bounds = array<i64: 1, 128>}, {pipeline_mode = #tpu.pipeline_mode<synchronous>, transform_indices = @transform_3, window_bounds = array<i64: 128, 128>}, {pipeline_mode = #tpu.pipeline_mode<synchronous>, transform_indices = @transform_4, window_bounds = array<i64: 1, 128>}, {pipeline_mode = #tpu.pipeline_mode<synchronous>, transform_indices = @transform_5, window_bounds = array<i64: 128, 128>}, {pipeline_mode = #tpu.pipeline_mode<synchronous>, transform_indices = @transform_6, window_bounds = array<i64: 1, 128>}, {transform_indices = @transform_7, window_bounds = array<i64: 8, 128>}]} {
    %c0 = arith.constant 0 : index
    %c0_0 = arith.constant 0 : index
    %0 = vector.load %arg1[%c0, %c0_0] : memref<8x128xf32, #tpu.memory_space<vmem>>, vector<8x128xf32>
    %1 = arith.truncf %0 : vector<8x128xf32> to vector<8x128xbf16>
    %c0_1 = arith.constant 0 : index
    %c0_2 = arith.constant 0 : index
    %2 = vector.load %arg2[%c0_1, %c0_2] : memref<128x128xbf16, #tpu.memory_space<vmem>>, vector<128x128xbf16>
    %cst = arith.constant dense<0.000000e+00> : vector<8x128xf32>
    %3 = tpu.matmul %1, %2, %cst {dimension_numbers = #tpu.dot_dimension_numbers<[1], [0], [0], [1], [0, 0, 1, 1], [], []>} : vector<8x128xbf16>, vector<128x128xbf16>, vector<8x128xf32> -> vector<8x128xf32>
    %c0_3 = arith.constant 0 : index
    %c0_4 = arith.constant 0 : index
    %4 = vector.load %arg3[%c0_3, %c0_4] : memref<1x128xf32, #tpu.memory_space<vmem>>, vector<1x128xf32>
    %5 = vector.broadcast %4 : vector<1x128xf32> to vector<8x128xf32>
    %6 = arith.addf %3, %5 : vector<8x128xf32>
    %cst_5 = arith.constant 0.000000e+00 : f32
    %7 = vector.broadcast %cst_5 : f32 to vector<8x128xf32>
    %8 = arith.maximumf %6, %7 : vector<8x128xf32>
    %9 = arith.truncf %8 : vector<8x128xf32> to vector<8x128xbf16>
    %c0_6 = arith.constant 0 : index
    %c0_7 = arith.constant 0 : index
    %10 = vector.load %arg4[%c0_6, %c0_7] : memref<128x128xbf16, #tpu.memory_space<vmem>>, vector<128x128xbf16>
    %cst_8 = arith.constant dense<0.000000e+00> : vector<8x128xf32>
    %11 = tpu.matmul %9, %10, %cst_8 {dimension_numbers = #tpu.dot_dimension_numbers<[1], [0], [0], [1], [0, 0, 1, 1], [], []>} : vector<8x128xbf16>, vector<128x128xbf16>, vector<8x128xf32> -> vector<8x128xf32>
    %c0_9 = arith.constant 0 : index
    %c0_10 = arith.constant 0 : index
    %12 = vector.load %arg5[%c0_9, %c0_10] : memref<1x128xf32, #tpu.memory_space<vmem>>, vector<1x128xf32>
    %13 = vector.broadcast %12 : vector<1x128xf32> to vector<8x128xf32>
    %14 = arith.addf %11, %13 : vector<8x128xf32>
    %cst_11 = arith.constant 0.000000e+00 : f32
    %15 = vector.broadcast %cst_11 : f32 to vector<8x128xf32>
    %16 = arith.maximumf %14, %15 : vector<8x128xf32>
    %17 = arith.truncf %16 : vector<8x128xf32> to vector<8x128xbf16>
    %c0_12 = arith.constant 0 : index
    %c0_13 = arith.constant 0 : index
    %18 = vector.load %arg6[%c0_12, %c0_13] : memref<128x128xbf16, #tpu.memory_space<vmem>>, vector<128x128xbf16>
    %cst_14 = arith.constant dense<0.000000e+00> : vector<8x128xf32>
    %19 = tpu.matmul %17, %18, %cst_14 {dimension_numbers = #tpu.dot_dimension_numbers<[1], [0], [0], [1], [0, 0, 1, 1], [], []>} : vector<8x128xbf16>, vector<128x128xbf16>, vector<8x128xf32> -> vector<8x128xf32>
    %c0_15 = arith.constant 0 : index
    %c0_16 = arith.constant 0 : index
    %20 = vector.load %arg7[%c0_15, %c0_16] : memref<1x128xf32, #tpu.memory_space<vmem>>, vector<1x128xf32>
    %21 = vector.broadcast %20 : vector<1x128xf32> to vector<8x128xf32>
    %22 = arith.addf %19, %21 : vector<8x128xf32>
    %23 = arith.negf %22 : vector<8x128xf32>
    %24 = math.exp %23 : vector<8x128xf32>
    %cst_17 = arith.constant 1.000000e+00 : f32
    %25 = vector.broadcast %cst_17 : f32 to vector<8x128xf32>
    %26 = arith.addf %25, %24 : vector<8x128xf32>
    %27 = arith.divf %25, %26 : vector<8x128xf32>
    %c0_18 = arith.constant 0 : index
    %c0_19 = arith.constant 0 : index
    %28 = vector.load %arg8[%c0_18, %c0_19] : memref<8x128xf32, #tpu.memory_space<vmem>>, vector<8x128xf32>
    tpu.vector_store %arg8[%c0_18, %c0_19], %27 {strides = array<i32>} : memref<8x128xf32, #tpu.memory_space<vmem>>, vector<8x128xf32>,
    return
  }
  func.func @transform_0(%arg0: i32) -> (i32, i32) {
    %c0_i32 = arith.constant 0 : i32
    %c0_i32_0 = arith.constant 0 : i32
    return %arg0, %c0_i32 : i32, i32
  }
  func.func @transform_1(%arg0: i32) -> (i32, i32) {
    %c0_i32 = arith.constant 0 : i32
    %c0_i32_0 = arith.constant 0 : i32
    %c0_i32_1 = arith.constant 0 : i32
    return %c0_i32, %c0_i32_0 : i32, i32
  }
  func.func @transform_2(%arg0: i32) -> (i32, i32) {
    %c0_i32 = arith.constant 0 : i32
    %c0_i32_0 = arith.constant 0 : i32
    %c0_i32_1 = arith.constant 0 : i32
    return %c0_i32, %c0_i32_0 : i32, i32
  }
  func.func @transform_3(%arg0: i32) -> (i32, i32) {
    %c0_i32 = arith.constant 0 : i32
    %c0_i32_0 = arith.constant 0 : i32
    %c0_i32_1 = arith.constant 0 : i32
    return %c0_i32, %c0_i32_0 : i32, i32
  }
  func.func @transform_4(%arg0: i32) -> (i32, i32) {
    %c0_i32 = arith.constant 0 : i32
    %c0_i32_0 = arith.constant 0 : i32
    %c0_i32_1 = arith.constant 0 : i32
    return %c0_i32, %c0_i32_0 : i32, i32
  }
  func.func @transform_5(%arg0: i32) -> (i32, i32) {
    %c0_i32 = arith.constant 0 : i32
    %c0_i32_0 = arith.constant 0 : i32
    %c0_i32_1 = arith.constant 0 : i32
    return %c0_i32, %c0_i32_0 : i32, i32
  }
  func.func @transform_6(%arg0: i32) -> (i32, i32) {
    %c0_i32 = arith.constant 0 : i32
    %c0_i32_0 = arith.constant 0 : i32
    %c0_i32_1 = arith.constant 0 : i32
    return %c0_i32, %c0_i32_0 : i32, i32
  }
  func.func @transform_7(%arg0: i32) -> (i32, i32) {
    %c0_i32 = arith.constant 0 : i32
    %c0_i32_0 = arith.constant 0 : i32
    return %arg0, %c0_i32 : i32, i32
  }
}

</mosaic_0001>

<bundles_post_ra>
// kernel: simple_fft_forward.1
= control target key start
LH: loop header
LB: loop body
LE: loop exit
PB: predicated region body
PF: predicated region fallthrough
CT: control target
= control target key end

     0   :  { %s554_s1 = inlined_call_operand.vmem [shape: bf16[128,128], index: 1, kind: input, shape index: {}]   ;;  %s555_s3 = inlined_call_operand.vmem [shape: bf16[128,128], index: 3, kind: input, shape index: {}]   ;;  %s556_s2 = inlined_call_operand.vmem [shape: f32[1,128], index: 2, kind: input, shape index: {}]   ;;  %s557_s0 = inlined_call_operand.vmem [shape: f32[8,128], index: 0, kind: input, shape index: {}]   ;;  %s558_s4 = inlined_call_operand.vmem [shape: f32[1,128], index: 4, kind: input, shape index: {}]   ;;  %s559_s5 = inlined_call_operand.vmem [shape: bf16[128,128], index: 5, kind: input, shape index: {}]   ;;  %s560_s6 = inlined_call_operand.vmem [shape: f32[1,128], index: 6, kind: input, shape index: {}]   ;;  %s561_s7 = inlined_call_operand.vmem [shape: f32[8,128], index: 7, kind: output, shape index: {}]  }
   0x1   :  { %v403_v0 = vld [vmem:[%s554_s1 + $0x38] sm:$0xff]  ;;  %v402_v1 = vld [vmem:[%s554_s1 + $0x30] sm:$0xff]  ;;  %v401_v4 = vld [vmem:[%s554_s1 + $0x28] sm:$0xff] }
   0x2   :  { %96 = vmatpush.bf16.msra.mxu0 %v403_v0  ;;  %v411_v2 = vld [vmem:[%s555_s3 + $0x38] sm:$0xff]  ;;  %v410_v3 = vld [vmem:[%s555_s3 + $0x30] sm:$0xff]  ;;  %v409_v5 = vld [vmem:[%s555_s3 + $0x28] sm:$0xff] }
   0x3   :  { %179 = vmatpush.bf16.msra.mxu1 %v411_v2  ;;  %v400_v6 = vld [vmem:[%s554_s1 + $0x20] sm:$0xff]  ;;  %v399_v8 = vld [vmem:[%s554_s1 + $0x18] sm:$0xff]  ;;  %v398_v10 = vld [vmem:[%s554_s1 + $0x10] sm:$0xff] }
   0x4   :  { %v408_v7 = vld [vmem:[%s555_s3 + $0x20] sm:$0xff]  ;;  %v407_v9 = vld [vmem:[%s555_s3 + $0x18] sm:$0xff]  ;;  %v406_v11 = vld [vmem:[%s555_s3 + $0x10] sm:$0xff] }
   0x5   :  { %v397_v12 = vld [vmem:[%s554_s1 + $0x8] sm:$0xff]  ;;  %v396_v13 = vld [vmem:[%s554_s1] sm:$0xff]  ;;  %v419_v18 = vld [vmem:[%s559_s5 + $0x38] sm:$0xff] }
   0x6   :  { %97 = vmatpush.bf16.msra.mxu0 %v402_v1  ;;  %v26_v14 = vld [vmem:[%s557_s0] sm:$0xff]  ;;  %v405_v16 = vld [vmem:[%s555_s3 + $0x8] sm:$0xff]  ;;  %262 = vmatpush.bf16.msra.mxu2 %v419_v18  ;;  %v418_v19 = vld [vmem:[%s559_s5 + $0x30] sm:$0xff] }
   0x7   :  { %180 = vmatpush.bf16.msra.mxu1 %v410_v3  ;;  %v27_v15 = vpack.c.bf16 %v26_v14, %v26_v14  ;;  %v404_v17 = vld [vmem:[%s555_s3] sm:$0xff]  ;;  %v417_v20 = vld [vmem:[%s559_s5 + $0x28] sm:$0xff]  ;;  %v415_v22 = vld [vmem:[%s559_s5 + $0x18] sm:$0xff] }
   0x8   :  { %v416_v21 = vld [vmem:[%s559_s5 + $0x20] sm:$0xff]  ;;  %v414_v23 = vld [vmem:[%s559_s5 + $0x10] sm:$0xff]  ;;  %v413_v30 = vld [vmem:[%s559_s5 + $0x8] sm:$0xff] }
   0x9   :  { %v420_v24 = vld [vmem:[%s556_s2] ss:$0 sm:$0xff] }
   0xa   :  { %98 = vmatpush.bf16.msra.mxu0 %v401_v4  ;;  %263 = vmatpush.bf16.msra.mxu2 %v418_v19  ;;  %v412_v31 = vld [vmem:[%s559_s5] sm:$0xff] }
   0xb   :  { %181 = vmatpush.bf16.msra.mxu1 %v409_v5  ;;  %v421_v32 = vld [vmem:[%s558_s4] ss:$0 sm:$0xff] }
   0xc   :  { %v422_v38 = vld [vmem:[%s560_s6] ss:$0 sm:$0xff] }
   0xe   :  { %99 = vmatpush.bf16.msra.mxu0 %v400_v6  ;;  %264 = vmatpush.bf16.msra.mxu2 %v417_v20 }
   0xf   :  { %182 = vmatpush.bf16.msra.mxu1 %v408_v7 }
  0x12   :  { %100 = vmatpush.bf16.msra.mxu0 %v399_v8  ;;  %265 = vmatpush.bf16.msra.mxu2 %v416_v21 }
  0x13   :  { %183 = vmatpush.bf16.msra.mxu1 %v407_v9 }
  0x16   :  { %101 = vmatpush.bf16.msra.mxu0 %v398_v10  ;;  %266 = vmatpush.bf16.msra.mxu2 %v415_v22 }
  0x17   :  { %184 = vmatpush.bf16.msra.mxu1 %v406_v11 }
  0x1a   :  { %102 = vmatpush.bf16.msra.mxu0 %v397_v12  ;;  %267 = vmatpush.bf16.msra.mxu2 %v414_v23 }
  0x1b   :  { %185 = vmatpush.bf16.msra.mxu1 %v405_v16 }
  0x1e   :  { %103 = vmatpush.bf16.msra.mxu0 %v396_v13  ;;  %268 = vmatpush.bf16.msra.mxu2 %v413_v30 }
  0x1f   :  { %186 = vmatpush.bf16.msra.mxu1 %v404_v17 }
  0x21   :  { %104 = vmatmul.bf16.vlgmr.msra.gmra.mxu0 %v27_v15 }
  0x22   :  { %269 = vmatpush.bf16.msra.mxu2 %v412_v31 }
  0x9e   :  { %v105_v25 = vpop.f32.mrf.mxu0 }
  0x9f   :  { %v106_v26 = vadd.f32 %v420_v24, %v105_v25 }
  0xa1   :  { %v109_v27 = vmax.f32 %v106_v26, 0.0 }
  0xa3   :  { %v110_v28 = vpack.c.bf16 %v109_v27, %v109_v27 }
  0xa5   :  { %187 = vmatmul.bf16.vlgmr.msra.gmra.mxu1 %v110_v28 }
  0xa6   :  { %v107_v29 = vpop.f32.mrf.mxu0 }
 0x122   :  { %v188_v33 = vpop.f32.mrf.mxu1 }
 0x123   :  { %v189_v34 = vadd.f32 %v421_v32, %v188_v33 }
 0x125   :  { %v192_v35 = vmax.f32 %v189_v34, 0.0 }
 0x127   :  { %v193_v36 = vpack.c.bf16 %v192_v35, %v192_v35 }
 0x129   :  { %270 = vmatmul.bf16.vlgmr.msra.gmra.mxu2 %v193_v36 }
 0x12a   :  { %v190_v37 = vpop.f32.mrf.mxu1 }
 0x1ac   :  { %v271_v39 = vpop.f32.mrf.mxu2 }
 0x1ad   :  { %v272_v40 = vadd.f32 %v422_v38, %v271_v39 }
 0x1af   :  { %v395_v41 = vmul.f32 -1.442695, %v272_v40 }
 0x1b1   :  { %423 = vpow2.f32 %v395_v41 }
 0x1b4   :  { %v273_v42 = vpop.f32.mrf.mxu2 }
 0x1b7   :  { %v424_v43 = vpop.eup %423 }
 0x1b8   :  { %v278_v44 = vadd.f32 1.0, %v424_v43 }
 0x1ba   :  { %425 = vrcp.f32 %v278_v44  ;;  %v290_v48 = vand.u32 2147483648, %v278_v44  ;;  %v288_v50 = vand.u32 2147483647, %v278_v44  ;;  %vm284_vm1 = vweird.f32 %v278_v44 }
 0x1bc   :  { %v291_v52 = vor.u32 1.1754944e-38, %v290_v48  ;;  %vm289_vm3 = vcmp.eq.f32.partialorder %v288_v50, 8.507059e+37 }
 0x1c0   :  { %v426_v45 = vpop.eup %425 }
 0x1c1   :  { %v280_v46 = vmul.f32 %v426_v45, %v278_v44  ;;  %vm285_vm0 = vweird.f32 %v426_v45 }
 0x1c2   :  { %vm286_vm2 = vmor %vm284_vm1, %vm285_vm0 }
 0x1c3   :  { %v281_v47 = vsub.f32 1.0, %v280_v46 }
 0x1c5   :  { %v282_v49 = vmul.f32 %v426_v45, %v281_v47 }
 0x1c7   :  { %v283_v51 = vadd.f32 %v426_v45, %v282_v49 }
 0x1c9   :  { %v287_v53 = vsel %vm286_vm2, %v426_v45, %v283_v51 }
 0x1ca   :  { %v292_v54 = vsel %vm289_vm3, %v291_v52, %v287_v53 }
 0x1cb   :  { %294 = vst [vmem:[%s561_s7] sm:$0xff] %v292_v54 }

</bundles_post_ra>
